<compile_context>
chip_gen: v5e
topology: v5e:2x2
jax: 0.10.0
libtpu: 0.0.40
codegen_flags: <defaults>
</compile_context>

<pallas_src>
import math

import jax
import jax.numpy as jnp
from jax.experimental import pallas as pl
from jax.experimental.pallas import tpu as pltpu

_SMALL_INPUT_BYTES = 1 << 20  # below this, a plain-JAX add beats a pallas_call


# --------------------- deterministic sinusoidal init ---------------------- #
def create_2d_positional_embedding(img_height, img_width, d_model):
    """JAX port of the PyTorch create_2d_positional_embedding (runs once)."""
    assert d_model % 2 == 0, "d_model should be even"
    assert img_height > 1 and img_width > 1, (
        "img_height/img_width must be > 1 (normalization divides by H-1, W-1)"
    )
    y_pos, x_pos = jnp.meshgrid(
        jnp.arange(img_height), jnp.arange(img_width), indexing="ij"
    )
    y_pos = y_pos.reshape(-1).astype(jnp.float32)
    x_pos = x_pos.reshape(-1).astype(jnp.float32)
    y_pos = y_pos / (img_height - 1) * 2 - 1
    x_pos = x_pos / (img_width - 1) * 2 - 1
    half = d_model // 2
    div_term = jnp.exp(
        jnp.arange(0, half).astype(jnp.float32) * (-math.log(10000.0) / half)
    )
    pos_y = jnp.outer(y_pos, div_term)  # (H*W, d_model/2)
    pos_x = jnp.outer(x_pos, div_term)  # (H*W, d_model/2)
    # even columns <- sin(pos_y), odd columns <- cos(pos_x)  (interleaved)
    pos_encoding = jnp.stack([jnp.sin(pos_y), jnp.cos(pos_x)], axis=-1).reshape(
        img_height * img_width, d_model
    )
    return pos_encoding.reshape(img_height, img_width, d_model)


# ------------------------------ Pallas kernel ------------------------------ #
def _add_pos_kernel(x_ref, pos_ref, o_ref):
    # x_ref / o_ref: (bn, bl) tile; pos_ref: (1, bl) tile broadcast over rows.
    o_ref[...] = x_ref[...] + pos_ref[...]


def _chip_config():
    """(target bytes per x buffer, scoped vmem limit) per TPU generation."""
    kind = ""
    try:
        kind = jax.devices()[0].device_kind.lower()
    except Exception:  # pragma: no cover - defensive only
        pass
    if "v6" in kind:
        # v6e: 128 MiB physical VMEM, ~1.4 TB/s HBM -> bigger tiles for free.
        return 8 << 20, 64 << 20
    if "v5 lite" in kind or "v5e" in kind or "v5litepod" in kind:
        # v5e: ~0.8 TB/s HBM, DMA time already dwarfs per-step overhead.
        return 2 << 20, 32 << 20
    # v7x (64 MiB physical / 32 MiB scoped) and unknown chips: conservative.
    return 4 << 20, 32 << 20


def _vmem_footprint(bn, bl, itemsize, sub):
    """Double-buffered x + out + pos, with sublane padding accounted for."""
    bn_pad = max(sub, -(-bn // sub) * sub)
    x_buf = bn_pad * bl * itemsize
    pos_buf = sub * bl * itemsize  # (1, bl) tile is padded to a full sublane tile
    return 2 * (2 * x_buf + pos_buf)


def _choose_blocks(n, l, itemsize, target_bytes, vmem_limit):
    """Pick (batch_tile, lane_tile) for the HBM-bound broadcast add."""
    # Native sublane tile per dtype: 8 (f32), 16 (bf16/f16), 32 (int8/fp8).
    sub = max(8, 32 // itemsize)

    # Lane tile: full extent when it fits the byte target, else lane-aligned.
    if l <= 128 or l * itemsize <= target_bytes:
        bl = l
    else:
        bl = max(128, (target_bytes // itemsize // 128) * 128)

    # Batch tile: grow toward the byte target in multiples of `sub`
    # (instead of a hard bn=8 cap) so realistic shapes reach ~target-size tiles.
    if n <= sub:
        bn = n  # full extent is always a legal block shape
    else:
        rows = max(1, target_bytes // max(1, bl * itemsize))
        bn = min(n, max(sub, (rows // sub) * sub))

    # Megacore: make sure a large problem yields >= 4 grid steps so each of
    # v7x's two TensorCores gets >= 2 steps (keeps DMA/compute overlap).
    min_steps = 4
    if (pl.cdiv(n, bn) * pl.cdiv(l, bl) < min_steps
            and n * l * itemsize > (2 << 20)):
        if n >= min_steps * sub:
            bn = max(sub, (n // min_steps // sub) * sub)
        elif l >= min_steps * 128:
            bl = max(128, (l // min_steps // 128) * 128)

    # Clamp the real (sublane-padded) footprint under the scoped VMEM limit.
    while _vmem_footprint(bn, bl, itemsize, sub) > (vmem_limit * 9) // 10:
        if bn > sub:
            bn = max(sub, (bn // 2 // sub) * sub)
        elif bl > 128:
            bl = max(128, (bl // 2 // 128) * 128)
        else:
            break
    return bn, bl


def img_pos_embedding_add(x_flat, pos_flat, *, target_bytes=None, donate_x=False):
    """x_flat: (N, L), pos_flat: (1, L)  ->  (N, L) = x_flat + pos_flat."""
    n, l = x_flat.shape
    assert pos_flat.shape == (1, l)
    itemsize = jnp.dtype(x_flat.dtype).itemsize
    chip_target, vmem_limit = _chip_config()
    if target_bytes is None:
        target_bytes = chip_target
    bn, bl = _choose_blocks(n, l, itemsize, target_bytes, vmem_limit)

    # grid = (lane_tiles, batch_tiles): batch axis is innermost, so the pos
    # block index (which depends only on the lane axis) is constant across the
    # inner loop -> Pallas keeps the pos tile resident instead of re-DMA'ing it.
    grid = (pl.cdiv(l, bl), pl.cdiv(n, bn))

    cost = pl.CostEstimate(
        flops=n * l,
        transcendentals=0,
        # read x, write out, read pos once per lane tile (resident over batch).
        bytes_accessed=(2 * n * l + l) * itemsize,
    )

    return pl.pallas_call(
        _add_pos_kernel,
        out_shape=jax.ShapeDtypeStruct((n, l), x_flat.dtype),
        grid_spec=pltpu.PrefetchScalarGridSpec(
            num_scalar_prefetch=0,
            grid=grid,
            in_specs=[
                pl.BlockSpec((bn, bl), lambda j, i: (i, j)),
                pl.BlockSpec((1, bl), lambda j, i: (0, j)),
            ],
            out_specs=pl.BlockSpec((bn, bl), lambda j, i: (i, j)),
        ),
        compiler_params=pltpu.CompilerParams(
            dimension_semantics=("parallel", "parallel"),
            vmem_limit_bytes=vmem_limit,
        ),
        cost_estimate=cost,
        input_output_aliases={0: 0} if donate_x else {},
    )(x_flat, pos_flat)


class ImgPosEmbedding:
    """JAX/Pallas equivalent of the PyTorch ImgPosEmbedding module."""

    def __init__(self, img_height, img_width, d_model, is_output_layer=False,
                 small_input_fallback=True):
        self.img_height = img_height
        self.img_width = img_width
        self.d_model = d_model
        self.small_input_fallback = small_input_fallback
        pe = create_2d_positional_embedding(img_height, img_width, d_model)
        if not is_output_layer:
            # parameter shape (1, 1, H, W, D)
            self.img_positional_encoding = pe[None, None]
        else:
            # parameter shape (1, H, W, D), negated
            self.img_positional_encoding = -pe[None]

    def __call__(self, x):
        # Broadcast semantics identical to PyTorch:
        #   not output layer: x (B, S, H, W, D) + (1, 1, H, W, D)
        #   output layer:     x (B, H, W, D)    + (1, H, W, D)
        h, w, d = self.img_height, self.img_width, self.d_model
        assert x.shape[-3:] == (h, w, d)
        pos = self.img_positional_encoding.astype(x.dtype)

        total_bytes = math.prod(x.shape) * jnp.dtype(x.dtype).itemsize
        if self.small_input_fallback and total_bytes < _SMALL_INPUT_BYTES:
            # A standalone pallas_call's launch + pipeline prologue dominates
            # tiny inputs; let XLA fuse the plain broadcast add instead.
            return x + pos

        lead = x.shape[:-3]
        n = math.prod(lead) if lead else 1
        l = h * w * d
        # Lane-dense flattening: the whole image lands on the 128-lane axis.
        x_flat = x.reshape(n, l)
        pos_flat = pos.reshape(1, l)
        out = img_pos_embedding_add(x_flat, pos_flat)
        return out.reshape(x.shape)


if __name__ == "__main__":
    B, S, H, W, D = 2, 2, 8, 8, 32
    key = jax.random.PRNGKey(0)
    x = jax.random.normal(key, (B, S, H, W, D), dtype=jnp.float32)

    # Force the Pallas path even at demo size (real callers keep the
    # small-input fallback on).
    mod = ImgPosEmbedding(H, W, D, is_output_layer=False,
                          small_input_fallback=False)
    out = jax.block_until_ready(mod(x))
    ref = x + mod.img_positional_encoding
    assert out.shape == (B, S, H, W, D)
    assert jnp.allclose(out, ref, atol=1e-6), "mismatch vs reference"

    # output-layer variant (negated embedding, 4-D input)
    mod_out = ImgPosEmbedding(H, W, D, is_output_layer=True,
                              small_input_fallback=False)
    x4 = jax.random.normal(jax.random.PRNGKey(1), (B, H, W, D), dtype=jnp.float32)
    out4 = jax.block_until_ready(mod_out(x4))
    ref4 = x4 + mod_out.img_positional_encoding
    assert jnp.allclose(out4, ref4, atol=1e-6), "mismatch vs reference (output)"

    # bf16 pass-through (dtype-aware sublane tiling; halves HBM traffic)
    xb = x.astype(jnp.bfloat16)
    outb = jax.block_until_ready(mod(xb))
    refb = xb + mod.img_positional_encoding.astype(jnp.bfloat16)
    assert jnp.allclose(outb.astype(jnp.float32), refb.astype(jnp.float32),
                        atol=1e-2), "mismatch vs reference (bf16)"

    # small-input fallback path (plain-JAX add for tiny tensors)
    mod_auto = ImgPosEmbedding(H, W, D)
    out_auto = jax.block_until_ready(mod_auto(x))
    assert jnp.allclose(out_auto, ref, atol=1e-6), "mismatch vs reference (auto)"

    # Multi-step grid paths (tiny target_bytes so tiling kicks in at small
    # sizes): exercises pos residency across the inner batch axis and
    # lane-axis tiling, which real shapes hit with the default targets.
    pos_small = mod.img_positional_encoding.reshape(1, H * W * D).astype(jnp.float32)
    x_rows = jax.random.normal(jax.random.PRNGKey(2), (64, H * W * D), jnp.float32)
    out_rows = jax.block_until_ready(
        img_pos_embedding_add(x_rows, pos_small, target_bytes=8 * 1024))
    assert jnp.allclose(out_rows, x_rows + pos_small, atol=1e-6), "batch-tiled path"

    x_lane = jax.random.normal(jax.random.PRNGKey(3), (8, 4 * H * W * D), jnp.float32)
    pos_lane = jnp.tile(pos_small, (1, 4))
    out_lane = jax.block_until_ready(
        img_pos_embedding_add(x_lane, pos_lane, target_bytes=8 * 1024))
    assert jnp.allclose(out_lane, x_lane + pos_lane, atol=1e-6), "lane-tiled path"

    print("KERNEL_OK")
</pallas_src>

<mosaic_0001>
module attributes {stable_mosaic.version = 11 : i64} {
  func.func @_add_pos_kernel(%arg0: i32, %arg1: i32, %arg2: memref<4x2048xf32, #tpu.memory_space<vmem>>, %arg3: memref<1x2048xf32, #tpu.memory_space<vmem>>, %arg4: memref<4x2048xf32, #tpu.memory_space<vmem>>) attributes {dimension_semantics = [#tpu.dimension_semantics<parallel>, #tpu.dimension_semantics<parallel>], iteration_bounds = array<i64: 1, 1>, scalar_prefetch = 0 : i64, scratch_operands = 0 : i64, tpu.core_type = #tpu.core_type<tc>, window_params = [{transform_indices = @transform_0, window_bounds = array<i64: 4, 2048>}, {transform_indices = @transform_1, window_bounds = array<i64: 1, 2048>}, {transform_indices = @transform_2, window_bounds = array<i64: 4, 2048>}]} {
    %c0 = arith.constant 0 : index
    %c0_0 = arith.constant 0 : index
    %0 = vector.load %arg2[%c0, %c0_0] : memref<4x2048xf32, #tpu.memory_space<vmem>>, vector<4x2048xf32>
    %c0_1 = arith.constant 0 : index
    %c0_2 = arith.constant 0 : index
    %1 = vector.load %arg3[%c0_1, %c0_2] : memref<1x2048xf32, #tpu.memory_space<vmem>>, vector<1x2048xf32>
    %2 = vector.broadcast %1 : vector<1x2048xf32> to vector<4x2048xf32>
    %3 = arith.addf %0, %2 : vector<4x2048xf32>
    %c0_3 = arith.constant 0 : index
    %c0_4 = arith.constant 0 : index
    %4 = vector.load %arg4[%c0_3, %c0_4] : memref<4x2048xf32, #tpu.memory_space<vmem>>, vector<4x2048xf32>
    tpu.vector_store %arg4[%c0_3, %c0_4], %3 {strides = array<i32>} : memref<4x2048xf32, #tpu.memory_space<vmem>>, vector<4x2048xf32>,
    return
  }
  func.func @transform_0(%arg0: i32, %arg1: i32) -> (i32, i32) {
    %c0_i32 = arith.constant 0 : i32
    return %arg1, %arg0 : i32, i32
  }
  func.func @transform_1(%arg0: i32, %arg1: i32) -> (i32, i32) {
    %c0_i32 = arith.constant 0 : i32
    %c0_i32_0 = arith.constant 0 : i32
    return %c0_i32, %arg0 : i32, i32
  }
  func.func @transform_2(%arg0: i32, %arg1: i32) -> (i32, i32) {
    %c0_i32 = arith.constant 0 : i32
    return %arg1, %arg0 : i32, i32
  }
}

</mosaic_0001>

<bundles_post_ra>
// kernel: tpu_custom_call.1
= control target key start
LH: loop header
LB: loop body
LE: loop exit
PB: predicated region body
PF: predicated region fallthrough
CT: control target
= control target key end

     0   :  { %7 = vsyncpa [#allocation3], 0  ;;  %s243_s0 = inlined_call_operand.hbm [shape: f32[4,2048], index: 0, kind: input, shape index: {}]   ;;  %s244_s1 = inlined_call_operand.hbm [shape: f32[1,2048], index: 1, kind: input, shape index: {}]   ;;  %s245_s2 = inlined_call_operand.hbm [shape: f32[4,2048], index: 2, kind: output, shape index: {}]  }
   0x1   :  { %8 = vsyncpa [#allocation6], 0 }
   0x2   :  { %9 = vsyncpa [#allocation4], 0  ;;  %s15_s11 = sshll.u32 %s243_s0, 4  ;;  %s208_s12 = smov [#allocation2]   ;;  %s16_s11 = int_to_ptr.hbm [resolvable:$true] %s15_s11 }
   0x3   :  { %s17_s13 = sshll.u32 %s208_s12, 4  ;;  %s26_s16 = sshll.u32 %s244_s1, 4  ;;  %s18_s13 = int_to_ptr.vmem [resolvable:$true] %s17_s13  ;;  %s27_s16 = int_to_ptr.hbm [resolvable:$true] %s26_s16 }
   0x4   :  { %20 = dma.hbm_to_vmem [thread:$0]  %s16_s11, 1024, %s18_s13, [#allocation3]  }
   0x5   :  { %s209_s17 = smov [#allocation5]  }
   0x6   :  { %s28_s18 = sshll.u32 %s209_s17, 4  ;;  %s29_s18 = int_to_ptr.vmem [resolvable:$true] %s28_s18 }
   0x7   :  { %31 = dma.hbm_to_vmem [thread:$0]  %s27_s16, 256, %s29_s18, [#allocation6]  }
   0x8   :  { %202 = dma.done.wait [#allocation3], 1024  }
   0x9   :  { %203 = vsyncadd [#allocation3], 4294966272 }
   0xa   :  { %204 = dma.done.wait [#allocation6], 256  }
   0xb   :  { %205 = vsyncadd [#allocation6], 4294967040  ;;  %v48_v0 = vld [vmem:[#allocation5] sm:$0xff]  ;;  %vm76_vm0 = vcmask 1043456   ;;  %v49_v9 = vld [vmem:[#allocation5 + $0x8] sm:$0xff]  ;;  %s210_s0 = smov [#allocation7]  }
   0xc   :  { %v52_v1 = vperm.slane %v48_v0, 0  ;;  %v53_v2 = vperm.slane %v48_v0, 1  ;;  %v54_v3 = vperm.slane %v48_v0, 2  ;;  %v55_v4 = vperm.slane %v48_v0, 3  ;;  %v40_v10 = vld [vmem:[#allocation2] sm:$0xff]  ;;  %v41_v12 = vld [vmem:[#allocation2 + $0x8] sm:$0xff] }
   0xd   :  { %v56_v5 = vperm.slane %v48_v0, 4  ;;  %v57_v6 = vperm.slane %v48_v0, 5  ;;  %v58_v7 = vperm.slane %v48_v0, 6  ;;  %v59_v8 = vperm.slane %v48_v0, 7  ;;  %v42_v16 = vld [vmem:[#allocation2 + $0x10] sm:$0xff]  ;;  %v43_v18 = vld [vmem:[#allocation2 + $0x18] sm:$0xff] }
   0xe   :  { %v68_v11 = vrot.slane %v53_v2, 4  ;;  %v69_v13 = vrot.slane %v55_v4, 4  ;;  %v60_v14 = vperm.slane %v49_v9, 0  ;;  %v61_v15 = vperm.slane %v49_v9, 1  ;;  %v44_v24 = vld [vmem:[#allocation2 + $0x20] sm:$0xff]  ;;  %v45_v34 = vld [vmem:[#allocation2 + $0x28] sm:$0xff] }
   0xf   :  { %v70_v17 = vrot.slane %v57_v6, 4  ;;  %v71_v19 = vrot.slane %v59_v8, 4  ;;  %v62_v20 = vperm.slane %v49_v9, 2  ;;  %v63_v21 = vperm.slane %v49_v9, 3  ;;  %v46_v42 = vld [vmem:[#allocation2 + $0x30] sm:$0xff]  ;;  %v47_v44 = vld [vmem:[#allocation2 + $0x38] sm:$0xff] }
  0x10   :  { %v77_v22 = vsel %vm76_vm0, %v52_v1, %v68_v11  ;;  %v78_v23 = vsel %vm76_vm0, %v54_v3, %v69_v13  ;;  %v72_v25 = vrot.slane %v61_v15, 4  ;;  %v64_v26 = vperm.slane %v49_v9, 4  ;;  %s114_s1 = sshll.u32 %s210_s0, 4  ;;  %s116_s21 = sshll.u32 %s245_s2, 4  ;;  %s115_s1 = int_to_ptr.vmem [resolvable:$true] %s114_s1  ;;  %s117_s21 = int_to_ptr.hbm [resolvable:$true] %s116_s21 }
  0x11   :  { %v93_v27 = vadd.f32 %v77_v22, %v40_v10  ;;  %v94_v28 = vadd.f32 %v78_v23, %v41_v12  ;;  %v79_v29 = vsel %vm76_vm0, %v56_v5, %v70_v17  ;;  %v80_v30 = vsel %vm76_vm0, %v58_v7, %v71_v19 }
  0x12   :  { %v95_v31 = vadd.f32 %v79_v29, %v42_v16  ;;  %v96_v32 = vadd.f32 %v80_v30, %v43_v18  ;;  %v81_v33 = vsel %vm76_vm0, %v60_v14, %v72_v25  ;;  %v73_v35 = vrot.slane %v63_v21, 4 }
  0x13   :  { %101 = vst [vmem:[#allocation7] sm:$0xff] %v93_v27  ;;  %v97_v36 = vadd.f32 %v81_v33, %v44_v24  ;;  %v65_v37 = vperm.slane %v49_v9, 5  ;;  %v66_v38 = vperm.slane %v49_v9, 6  ;;  %v67_v39 = vperm.slane %v49_v9, 7 }
  0x14   :  { %102 = vst [vmem:[#allocation7 + $0x8] sm:$0xff] %v94_v28  ;;  %v82_v40 = vsel %vm76_vm0, %v62_v20, %v73_v35 }
  0x15   :  { %103 = vst [vmem:[#allocation7 + $0x10] sm:$0xff] %v95_v31  ;;  %v98_v41 = vadd.f32 %v82_v40, %v45_v34  ;;  %v74_v43 = vrot.slane %v65_v37, 4  ;;  %v75_v45 = vrot.slane %v67_v39, 4 }
  0x16   :  { %104 = vst [vmem:[#allocation7 + $0x18] sm:$0xff] %v96_v32 }
  0x17   :  { %105 = vst [vmem:[#allocation7 + $0x20] sm:$0xff] %v97_v36  ;;  %v83_v46 = vsel %vm76_vm0, %v64_v26, %v74_v43  ;;  %v84_v47 = vsel %vm76_vm0, %v66_v38, %v75_v45 }
  0x18   :  { %106 = vst [vmem:[#allocation7 + $0x28] sm:$0xff] %v98_v41  ;;  %v99_v48 = vadd.f32 %v83_v46, %v46_v42  ;;  %v100_v49 = vadd.f32 %v84_v47, %v47_v44 }
  0x1a   :  { %107 = vst [vmem:[#allocation7 + $0x30] sm:$0xff] %v99_v48 }
  0x1b   :  { %108 = vst [vmem:[#allocation7 + $0x38] sm:$0xff] %v100_v49 }
  0x1c   :  { %119 = dma.vmem_to_hbm [thread:$0]  %s115_s1, 1024, %s117_s21, [#allocation4]  }
  0x1d   :  { %206 = dma.done.wait [#allocation4], 1024  }
  0x1e   :  { %207 = vsyncadd [#allocation4], 4294966272 }
  0x1f   :  { %124 = vsyncpa [#allocation3], 1 }
  0x20   :  { %125 = vsyncpa [#allocation6], 1 }
  0x21   :  { %126 = vsyncpa [#allocation4], 1 }

</bundles_post_ra>
